<compile_context>
chip_gen: v7x
topology: tpu7x:2x2x1
jax: 0.10.0
libtpu: 0.0.40
codegen_flags: <defaults>
</compile_context>

<pallas_src>
import jax
import jax.numpy as jnp
from jax.experimental import pallas as pl
from jax.experimental.pallas import tpu as pltpu


def _reg_weighted_l1_kernel(x_ref, o_ref):
    # x_ref : VMEM (3, Rp, 128) f32 -- stacked [pred; mask; target], zero padded
    # o_ref : SMEM (1, 1) f32      -- final loss scalar
    pred = x_ref[0]
    msk = x_ref[1]
    tgt = x_ref[2]
    # |(p - t) * m| == |p*m - t*m| for finite values; saves one VPU multiply/elem.
    abs_sum = jnp.sum(jnp.abs((pred - tgt) * msk))
    msk_sum = jnp.sum(msk)
    o_ref[0, 0] = abs_sum / (msk_sum + jnp.float32(1e-4))


@jax.jit
def reg_weighted_l1_loss(output_nchw, mask, ind, target):
    """output_nchw: (B, C, H, W); mask/target: (B, K, C); ind: (B, K) int.

    NOTE: out-of-range `ind` values are clamped (torch.gather would error) and
    `mask` is expected already expanded to (B, K, C), matching the spec module's
    elementwise `pred * mask`.
    """
    b, c, h, w = output_nchw.shape
    k = ind.shape[1]
    hw = h * w

    # ---- gather (reads only B*K*C feature elements; no full-map transpose) ----
    feat = output_nchw.reshape(b, c, hw)                       # free view, stays NCHW
    idx = jnp.clip(ind.astype(jnp.int32), 0, hw - 1)           # defined behavior for OOB ind
    pred = jnp.take_along_axis(feat, idx[:, None, :], axis=2)  # (B, C, K)  -- tiny
    pred = jnp.transpose(pred, (0, 2, 1))                      # (B, K, C)  -- tiny

    # ---- one stacked, sublane+lane-dense payload: (3, Rp, 128), single pad ----
    l = b * k * c
    rows = -(-l // 128)                    # ceil(L / 128)
    rp = max(8, ((rows + 7) // 8) * 8)     # sublane-dense: multiple of 8
    lp = rp * 128

    def _f32_flat(x):
        x = x if x.dtype == jnp.float32 else x.astype(jnp.float32)
        return x.reshape(-1)

    stacked = jnp.stack([_f32_flat(pred), _f32_flat(mask), _f32_flat(target)])
    if lp != l:  # zero padding contributes 0 to both sums (mask pad == 0)
        stacked = jnp.pad(stacked, ((0, 0), (0, lp - l)))
    stacked = stacked.reshape(3, rp, 128)

    loss = pl.pallas_call(
        _reg_weighted_l1_kernel,
        out_shape=jax.ShapeDtypeStruct((1, 1), jnp.float32),
        in_specs=[pl.BlockSpec(memory_space=pltpu.MemorySpace.VMEM)],
        out_specs=pl.BlockSpec(memory_space=pltpu.MemorySpace.SMEM),
        cost_estimate=pl.CostEstimate(
            flops=4 * lp,
            transcendentals=0,
            bytes_accessed=3 * lp * 4 + 4,
        ),
    )(stacked)
    return loss[0, 0]


if __name__ == "__main__":
    B, C, H, W, K = 2, 4, 16, 16, 8

    key = jax.random.PRNGKey(0)
    k1, k2, k3, k4 = jax.random.split(key, 4)
    output = jax.random.normal(k1, (B, C, H, W), dtype=jnp.float32)
    ind = jax.random.randint(k2, (B, K), 0, H * W, dtype=jnp.int32)
    mask = (jax.random.uniform(k3, (B, K, C)) > 0.3).astype(jnp.float32)
    target = jax.random.normal(k4, (B, K, C), dtype=jnp.float32)

    loss = jax.block_until_ready(reg_weighted_l1_loss(output, mask, ind, target))

    # Pure-JAX reference (canonical _transpose_and_gather_feat path).
    feat_ref = jnp.transpose(output, (0, 2, 3, 1)).reshape(B, H * W, C)
    pred_ref = jnp.take_along_axis(
        feat_ref, jnp.broadcast_to(ind[:, :, None], (B, K, C)), axis=1)
    ref = jnp.sum(jnp.abs(pred_ref * mask - target * mask)) / (jnp.sum(mask) + 1e-4)
    assert jnp.allclose(loss, ref, rtol=1e-5, atol=1e-6), (loss, ref)

    print("KERNEL_OK")
</pallas_src>

<mosaic_0001>
module attributes {stable_mosaic.version = 11 : i64} {
  func.func @_reg_weighted_l1_kernel(%arg0: memref<3x8x128xf32, #tpu.memory_space<vmem>>, %arg1: memref<1x1xf32, #tpu.memory_space<smem>>) attributes {dimension_semantics = [], scalar_prefetch = 0 : i64, scratch_operands = 0 : i64, tpu.core_type = #tpu.core_type<tc>} {
    %c0 = arith.constant 0 : index
    %c0_0 = arith.constant 0 : index
    %c0_1 = arith.constant 0 : index
    %0 = vector.load %arg0[%c0, %c0_0, %c0_1] : memref<3x8x128xf32, #tpu.memory_space<vmem>>, vector<1x8x128xf32>
    %1 = vector.shape_cast %0 : vector<1x8x128xf32> to vector<8x128xf32>
    %c1 = arith.constant 1 : index
    %c0_2 = arith.constant 0 : index
    %c0_3 = arith.constant 0 : index
    %2 = vector.load %arg0[%c1, %c0_2, %c0_3] : memref<3x8x128xf32, #tpu.memory_space<vmem>>, vector<1x8x128xf32>
    %3 = vector.shape_cast %2 : vector<1x8x128xf32> to vector<8x128xf32>
    %c2 = arith.constant 2 : index
    %c0_4 = arith.constant 0 : index
    %c0_5 = arith.constant 0 : index
    %4 = vector.load %arg0[%c2, %c0_4, %c0_5] : memref<3x8x128xf32, #tpu.memory_space<vmem>>, vector<1x8x128xf32>
    %5 = vector.shape_cast %4 : vector<1x8x128xf32> to vector<8x128xf32>
    %6 = arith.subf %1, %5 : vector<8x128xf32>
    %7 = arith.mulf %6, %3 : vector<8x128xf32>
    %8 = math.absf %7 : vector<8x128xf32>
    %9 = vector.shape_cast %8 : vector<8x128xf32> to vector<1x8x128xf32>
    %cst = arith.constant dense<0.000000e+00> : vector<1xf32>
    %10 = vector.multi_reduction <add>, %9, %cst [1, 2] : vector<1x8x128xf32> to vector<1xf32>
    %11 = vector.shape_cast %10 : vector<1xf32> to vector<1x1x1xf32>
    %12 = vector.extract %11[0, 0, 0] : f32 from vector<1x1x1xf32>
    %13 = vector.shape_cast %3 : vector<8x128xf32> to vector<1x8x128xf32>
    %cst_6 = arith.constant dense<0.000000e+00> : vector<1xf32>
    %14 = vector.multi_reduction <add>, %13, %cst_6 [1, 2] : vector<1x8x128xf32> to vector<1xf32>
    %15 = vector.shape_cast %14 : vector<1xf32> to vector<1x1x1xf32>
    %16 = vector.extract %15[0, 0, 0] : f32 from vector<1x1x1xf32>
    %cst_7 = arith.constant 9.99999974E-5 : f32
    %17 = arith.addf %16, %cst_7 : f32
    %18 = arith.divf %12, %17 : f32
    %c0_8 = arith.constant 0 : index
    %c0_9 = arith.constant 0 : index
    %19 = memref.load %arg1[%c0_8, %c0_9] : memref<1x1xf32, #tpu.memory_space<smem>>
    memref.store %18, %arg1[%c0_8, %c0_9] : memref<1x1xf32, #tpu.memory_space<smem>>
    return
  }
}

</mosaic_0001>

<bundles_post_ra>
// kernel: reg_weighted_l1_loss.1
= control target key start
LH: loop header
LB: loop body
LE: loop exit
PB: predicated region body
PF: predicated region fallthrough
CT: control target
= control target key end

     0   :  { %s110_s0 = inlined_call_operand.vmem [shape: f32[3,8,128], index: 0, kind: input, shape index: {}]   ;;  %s111_s1 = inlined_call_operand.hbm [shape: f32[1,1], index: 1, kind: output, shape index: {}]  }
   0x1   :  { %v9_v0 = vld [vmem:[%s110_s0] sm:$0xff]  ;;  %v55_v1 = vld [vmem:[%s110_s0 + $0x8] sm:$0xff]  ;;  %v56_v2 = vld [vmem:[%s110_s0 + $0x10] sm:$0xff] }
   0x2   :  { %v14_v3 = vsub.f32 %v9_v0, %v56_v2 }
   0x3   :  { %6 = vsyncpa [#allocation3], 0  ;;  %s66_s18 = scalar_lea.hbm %s111_s1, 16 }
   0x4   :  { %v15_v4 = vmul.f32 %v55_v1, %v14_v3  ;;  %p67_p0 = scmp.ne.s32.totalorder %s111_s1, %s66_s18  ;;  %p70_p1 = scmp.lt.u32.totalorder %s66_s18, %s111_s1 }
   0x6   :  { %v16_v5 = vand.u32 2147483647, %v15_v4  ;;  %p72_p2 = pnand %p70_p1, %p67_p0 }
   0x8   :  { %17 = vadd.xlane.f32.xlu0 %v16_v5 }
   0xc   :  { %26 = vadd.xlane.f32.xlu0 %v55_v1 }
  0x95   :  { %v18_v6 = vpop.xlane.xlu0 %17 }
  0x96   :  { %v19_v7 = vrot.slane %v18_v6, 4 }
  0x98   :  { %v20_v8 = vadd.f32 %v19_v7, %v18_v6 }
  0x99   :  { %v27_v9 = vpop.xlane.xlu0 %26 }
  0x9a   :  { %v21_v10 = vrot.slane %v20_v8, 2  ;;  %v28_v11 = vrot.slane %v27_v9, 4 }
  0x9c   :  { %v29_v12 = vadd.f32 %v28_v11, %v27_v9  ;;  %v22_v13 = vadd.f32 %v21_v10, %v20_v8 }
  0x9e   :  { %v30_v14 = vrot.slane %v29_v12, 2  ;;  %v23_v15 = vrot.slane %v22_v13, 1 }
  0xa0   :  { %v31_v16 = vadd.f32 %v30_v14, %v29_v12  ;;  %v24_v17 = vadd.f32 %v23_v15, %v22_v13 }
  0xa2   :  { %57 = vpush %v24_v17  ;;  %v32_v18 = vrot.slane %v31_v16, 1 }
  0xa4   :  { %v33_v19 = vadd.f32 %v32_v18, %v31_v16 }
  0xa6   :  { %59 = vpush %v33_v19 }
  0xd3   :  { %s58_s0 = spop %57 }
  0xd7   :  { %s60_s12 = spop %59 }
  0xd8   :  { %s35_s13 = sadd.f32 0.0001, %s60_s12 }
  0xda   :  { %v36_v20 = vstv %s35_s13 }
  0xdb   :  { %64 = vrcp.f32 %v36_v20 }
  0xe5   :  { %v65_v21 = vpop.eup %64 }
  0xe6   :  { %61 = vpush %v65_v21 }
 0x117   :  { %s62_s14 = spop %61 }
 0x118   :  { %s39_s15 = smul.f32 %s62_s14, %s58_s0 }
 0x11a   :  { %41 = sst [smem:[#allocation2]] %s39_s15 }
 0x11b   :  { %75 = shalt.err (!%p72_p2)
}
 0x11c   :  { %s78_s23 = smov [#allocation2]  }
 0x11d   :  { %49 = dma.smem_to_hbm %s78_s23, 16, %s111_s1, [#allocation3]  }
 0x11e   :  { %76 = dma.done.wait [#allocation3], 16  }
 0x11f   :  { %77 = vsyncadd [#allocation3], 4294967280 }
 0x120   :  { %53 = sfence }
 0x121   :  { %54 = vsyncpa [#allocation3], 1 }

</bundles_post_ra>
